<compile_context>
chip_gen: v6e
topology: v6e:2x2x1
jax: 0.10.0
libtpu: 0.0.40
codegen_flags: <defaults>
</compile_context>

<pallas_src>
import jax
import jax.numpy as jnp
from jax.experimental import pallas as pl
from jax.experimental.pallas import tpu as pltpu

_LANES = 128               # vreg lane width
_DEFAULT_TILE_ROWS = 4096  # 4096 x 128 x 4B = 2 MiB per f32 block


def _logreg_kernel(w_ref, b_ref, x_ref, o_ref):
    # w_ref, b_ref: (1,) f32 scalars in SMEM.  x_ref/o_ref: (tile_rows, 128) VMEM tiles.
    w = w_ref[0]
    b = b_ref[0]
    z = x_ref[...] * w + b                      # Linear(1, 1): x * w + b (VPU FMA)
    # Exact sigmoid via a single transcendental: sigmoid(z) = 0.5 * tanh(z/2) + 0.5.
    o_ref[...] = 0.5 * jnp.tanh(0.5 * z) + 0.5


def logistic_regression_forward(x, weight, bias, *, tile_rows=_DEFAULT_TILE_ROWS):
    """x: (N, 1) f32;  weight: (1, 1) f32;  bias: (1,) f32  ->  (N, 1) f32."""
    n = x.shape[0]
    w = weight.reshape(1).astype(jnp.float32)
    b = bias.reshape(1).astype(jnp.float32)
    xf = x.reshape(-1).astype(jnp.float32)

    # Pad only to the next multiple of 128 (<= 127 extra elements) so the batch
    # can be viewed as a lane-dense (rows, 128) slab.
    n_pad = -(-n // _LANES) * _LANES
    if n_pad != n:
        xf = jnp.pad(xf, (0, n_pad - n))
    rows = n_pad // _LANES
    x2d = xf.reshape(rows, _LANES)

    # Row tile: multiple of 8 sublanes; aim for >= 2 grid steps so both of
    # v7x's TensorCores get work; ragged tail handled by partial-block masking.
    if rows <= 8:
        tile_rows = rows                       # full-extent block, grid = 1
    else:
        rows_per_block = -(-rows // 2)         # >= 2 blocks when possible
        tile_rows = max(8, min(tile_rows, ((rows_per_block + 7) // 8) * 8))
    grid = (pl.cdiv(rows, tile_rows),)

    n_elems = rows * _LANES
    cost = pl.CostEstimate(
        flops=5 * n_elems,                     # mul, add, 2x scale, add
        transcendentals=n_elems,               # one tanh per element
        bytes_accessed=8 * n_elems,            # f32 in + f32 out
    )

    out2d = pl.pallas_call(
        _logreg_kernel,
        out_shape=jax.ShapeDtypeStruct((rows, _LANES), jnp.float32),
        grid=grid,
        in_specs=[
            pl.BlockSpec(memory_space=pltpu.MemorySpace.SMEM),    # w (whole array)
            pl.BlockSpec(memory_space=pltpu.MemorySpace.SMEM),    # b (whole array)
            pl.BlockSpec((tile_rows, _LANES), lambda i: (i, 0)),  # x tile
        ],
        out_specs=pl.BlockSpec((tile_rows, _LANES), lambda i: (i, 0)),
        compiler_params=pltpu.CompilerParams(
            dimension_semantics=("parallel",),
        ),
        cost_estimate=cost,
    )(w, b, x2d)

    # Drop the (<= 127-element) padded tail and restore the (N, 1) column.
    return out2d.reshape(n_pad)[:n].reshape(n, 1)


if __name__ == "__main__":
    # Same data as the PyTorch script.
    x = jnp.array([1, 5, 10, 10, 25, 50, 70, 75, 100],
                  dtype=jnp.float32).reshape(-1, 1)

    # Deterministic parameter init mimicking nn.Linear(1, 1):
    # uniform(-1/sqrt(fan_in), 1/sqrt(fan_in)) with fan_in = 1.
    key = jax.random.PRNGKey(0)
    k_w, k_b = jax.random.split(key)
    weight = jax.random.uniform(k_w, (1, 1), jnp.float32, minval=-1.0, maxval=1.0)
    bias = jax.random.uniform(k_b, (1,), jnp.float32, minval=-1.0, maxval=1.0)

    out = jax.block_until_ready(logistic_regression_forward(x, weight, bias))

    # Reference check in plain JAX (exact sigmoid -> tight tolerance).
    ref = jax.nn.sigmoid(x @ weight.T + bias)
    assert out.shape == (9, 1), out.shape
    assert jnp.allclose(out, ref, atol=1e-5, rtol=1e-5), (out, ref)

    print("KERNEL_OK")
</pallas_src>

<mosaic_0001>
module attributes {stable_mosaic.version = 11 : i64} {
  func.func @_logreg_kernel(%arg0: i32, %arg1: memref<1xf32, #tpu.memory_space<smem>>, %arg2: memref<1xf32, #tpu.memory_space<smem>>, %arg3: memref<1x128xf32, #tpu.memory_space<vmem>>, %arg4: memref<1x128xf32, #tpu.memory_space<vmem>>) attributes {dimension_semantics = [#tpu.dimension_semantics<parallel>], iteration_bounds = array<i64: 1>, scalar_prefetch = 0 : i64, scratch_operands = 0 : i64, tpu.core_type = #tpu.core_type<tc>, window_params = [{transform_indices = @transform_0, window_bounds = array<i64: 1>}, {transform_indices = @transform_1, window_bounds = array<i64: 1>}, {transform_indices = @transform_2, window_bounds = array<i64: 1, 128>}, {transform_indices = @transform_3, window_bounds = array<i64: 1, 128>}]} {
    %c0 = arith.constant 0 : index
    %0 = memref.load %arg1[%c0] : memref<1xf32, #tpu.memory_space<smem>>
    %c0_0 = arith.constant 0 : index
    %1 = memref.load %arg2[%c0_0] : memref<1xf32, #tpu.memory_space<smem>>
    %c0_1 = arith.constant 0 : index
    %c0_2 = arith.constant 0 : index
    %2 = vector.load %arg3[%c0_1, %c0_2] : memref<1x128xf32, #tpu.memory_space<vmem>>, vector<1x128xf32>
    %3 = vector.broadcast %0 : f32 to vector<1x128xf32>
    %4 = arith.mulf %2, %3 : vector<1x128xf32>
    %5 = vector.broadcast %1 : f32 to vector<1x128xf32>
    %6 = arith.addf %4, %5 : vector<1x128xf32>
    %cst = arith.constant 5.000000e-01 : f32
    %7 = vector.broadcast %cst : f32 to vector<1x128xf32>
    %8 = arith.mulf %7, %6 : vector<1x128xf32>
    %9 = math.tanh %8 : vector<1x128xf32>
    %cst_3 = arith.constant 5.000000e-01 : f32
    %10 = vector.broadcast %cst_3 : f32 to vector<1x128xf32>
    %11 = arith.mulf %10, %9 : vector<1x128xf32>
    %cst_4 = arith.constant 5.000000e-01 : f32
    %12 = vector.broadcast %cst_4 : f32 to vector<1x128xf32>
    %13 = arith.addf %11, %12 : vector<1x128xf32>
    %c0_5 = arith.constant 0 : index
    %c0_6 = arith.constant 0 : index
    %14 = vector.load %arg4[%c0_5, %c0_6] : memref<1x128xf32, #tpu.memory_space<vmem>>, vector<1x128xf32>
    tpu.vector_store %arg4[%c0_5, %c0_6], %13 {strides = array<i32>} : memref<1x128xf32, #tpu.memory_space<vmem>>, vector<1x128xf32>,
    return
  }
  func.func @transform_0(%arg0: i32) -> i32 {
    %c0_i32 = arith.constant 0 : i32
    %c0_i32_0 = arith.constant 0 : i32
    return %c0_i32 : i32
  }
  func.func @transform_1(%arg0: i32) -> i32 {
    %c0_i32 = arith.constant 0 : i32
    %c0_i32_0 = arith.constant 0 : i32
    return %c0_i32 : i32
  }
  func.func @transform_2(%arg0: i32) -> (i32, i32) {
    %c0_i32 = arith.constant 0 : i32
    %c0_i32_0 = arith.constant 0 : i32
    return %arg0, %c0_i32 : i32, i32
  }
  func.func @transform_3(%arg0: i32) -> (i32, i32) {
    %c0_i32 = arith.constant 0 : i32
    %c0_i32_0 = arith.constant 0 : i32
    return %arg0, %c0_i32 : i32, i32
  }
}

</mosaic_0001>

<bundles_post_ra>
// kernel: tpu_custom_call.1
= control target key start
LH: loop header
LB: loop body
LE: loop exit
PB: predicated region body
PF: predicated region fallthrough
CT: control target
= control target key end

     0   :  { %s101_s0 = inlined_call_operand.<no memory space> [shape: f32[1], index: 0, kind: input, shape index: {}]   ;;  %s102_s1 = inlined_call_operand.<no memory space> [shape: f32[1], index: 1, kind: input, shape index: {}]   ;;  %s103_s2 = inlined_call_operand.vmem [shape: f32[1,128], index: 2, kind: input, shape index: {}]   ;;  %s104_s3 = inlined_call_operand.hbm [shape: f32[1,128], index: 3, kind: output, shape index: {}]  }
   0x1   :  { %v19_v0 = vld [vmem:[%s103_s2] sm:$0x1]  ;;  %v20_v1 = vstv %s101_s0  ;;  %v22_v2 = vstv %s102_s1 }
   0x2   :  { %10 = vsyncpa [#allocation5], 0  ;;  %v21_v3 = vmul.f32 %v20_v1, %v19_v0  ;;  %s68_s18 = smov [#allocation4]  }
   0x3   :  { %s35_s19 = sshll.u32 %s68_s18, 4  ;;  %s36_s19 = int_to_ptr.vmem [resolvable:$true] %s35_s19 }
   0x4   :  { %v23_v4 = vadd.f32 %v22_v2, %v21_v3  ;;  %s46_s2 = scalar_lea.vmem %s36_s19, 16  ;;  %s50_s20 = scalar_lea.vmem %s36_s19, 32 }
   0x5   :  { %p47_p0 = scmp.ne.s32.totalorder %s36_s19, %s46_s2  ;;  %p51_p1 = scmp.lt.s32.totalorder %s36_s19, %s36_s19 }
   0x6   :  { %v24_v5 = vmul.f32 0.5, %v23_v4  ;;  %p52_p2 = scmp.lt.s32.totalorder %s50_s20, %s46_s2 }
   0x8   :  { %44 = vtanh.f32 %v24_v5  ;;  %p53_p3 = por %p52_p2, %p51_p1 }
   0xa   :  { %p54_p4 = pnand %p53_p3, %p47_p0 }
  0x15   :  { %v45_v6 = vpop.eup %44 }
  0x16   :  { %v26_v7 = vmul.f32 0.5, %v45_v6 }
  0x18   :  { %v27_v8 = vadd.f32 0.5, %v26_v7 }
  0x1a   :  { %28 = vst [vmem:[#allocation4] sm:$0x1] %v27_v8 }
  0x1b   :  { %57 = shalt.err (!%p54_p4)
}
  0x1c   :  { %38 = dma.vmem_to_hbm [thread:$0]  %s36_s19, 16, %s104_s3, [#allocation5]  }
  0x1d   :  { %66 = dma.done.wait [#allocation5], 16  }
  0x1e   :  { %67 = vsyncadd [#allocation5], 4294967280 }
  0x1f   :  { %42 = vsyncpa [#allocation5], 1 }

</bundles_post_ra>
